<compile_context>
chip_gen: v6e
topology: v6e:2x2x1
jax: 0.10.0
libtpu: 0.0.40
codegen_flags: <defaults>
</compile_context>

<pallas_src>
import jax
import jax.numpy as jnp
from jax.experimental import pallas as pl
from jax.experimental.pallas import tpu as pltpu

LANE = 128


def _ru(x, m):
    return (x + m - 1) // m * m


def init_params(key, hidden_dim=32, num_users=6, num_locations=5, num_activities=9):
    """Synthetic init mirroring the PyTorch module's shapes (weights stored (in, out))."""
    D = hidden_dim * 2
    n1 = num_users * 2
    n2 = num_users * (num_locations + 1)
    n3 = num_users * (num_activities + 1)
    h2 = D // 2
    h4 = D // 4
    keys = jax.random.split(key, 12)

    def lin(kw, kb, fan_in, fan_out):
        bound = 1.0 / jnp.sqrt(fan_in)
        w = jax.random.uniform(kw, (fan_in, fan_out), jnp.float32, -bound, bound)
        b = jax.random.uniform(kb, (1, fan_out), jnp.float32, -bound, bound)
        return w, b

    w1, b1 = lin(keys[0], keys[1], D, n1)
    w2a, b2a = lin(keys[2], keys[3], D, h2)
    w2b, b2b = lin(keys[4], keys[5], h2, n2)
    w3a, b3a = lin(keys[6], keys[7], D, h2)
    w3b, b3b = lin(keys[8], keys[9], h2, h4)
    w3c, b3c = lin(keys[10], keys[11], h4, n3)
    return dict(w1=w1, b1=b1, w2a=w2a, b2a=b2a, w2b=w2b, b2b=b2b,
                w3a=w3a, b3a=b3a, w3b=w3b, b3b=b3b, w3c=w3c, b3c=b3c)


def pack_params(p, *, compute_dtype=jnp.bfloat16):
    """Fuse per-head weights into lane-aligned blocks whose logits land directly in a
    shared 128-lane output slab (done once, outside the kernel)."""
    w1, w2a, w2b = p["w1"], p["w2a"], p["w2b"]
    w3a, w3b, w3c = p["w3a"], p["w3b"], p["w3c"]
    b1, b2a, b2b = p["b1"].reshape(1, -1), p["b2a"].reshape(1, -1), p["b2b"].reshape(1, -1)
    b3a, b3b, b3c = p["b3a"].reshape(1, -1), p["b3b"].reshape(1, -1), p["b3c"].reshape(1, -1)

    D, n1 = w1.shape
    h2 = w2a.shape[1]
    n2 = w2b.shape[1]
    h4 = w3b.shape[1]
    n3 = w3c.shape[1]

    P2, P3 = _ru(h2, LANE), _ru(h2, LANE)       # stage-1 hidden segments (head2-a, head3-a)
    Q3 = _ru(h4, LANE)                          # stage-2 hidden segment (head3-b)
    SLAB = _ru(n1 + n2 + n3, LANE)              # shared output slab width (lane-dense)
    o1_off, o2_off, o3_off = 0, n1, n1 + n2     # logit lane offsets within the slab

    # Stage 1: x @ [ w2a(pad P2) | w3a(pad P3) | slab-seg with w1 at lanes o1_off.. ]
    S1 = P2 + P3 + SLAB
    ws1 = jnp.zeros((D, S1), jnp.float32)
    ws1 = ws1.at[:, :h2].set(w2a)
    ws1 = ws1.at[:, P2:P2 + h2].set(w3a)
    ws1 = ws1.at[:, P2 + P3 + o1_off:P2 + P3 + o1_off + n1].set(w1)
    bs1 = jnp.zeros((1, S1), jnp.float32)
    bs1 = bs1.at[:, :h2].set(b2a)
    bs1 = bs1.at[:, P2:P2 + h2].set(b3a)
    bs1 = bs1.at[:, P2 + P3 + o1_off:P2 + P3 + o1_off + n1].set(b1)

    # Stage 2: relu([h2 | h3]) @ [ w3b(pad Q3) | slab-seg with w2b at lanes o2_off.. ]
    S2 = Q3 + SLAB
    ws2 = jnp.zeros((P2 + P3, S2), jnp.float32)
    ws2 = ws2.at[P2:P2 + h2, :h4].set(w3b)                                # h3 -> h4
    ws2 = ws2.at[:h2, Q3 + o2_off:Q3 + o2_off + n2].set(w2b)             # h2 -> head2 logits
    bs2 = jnp.zeros((1, S2), jnp.float32)
    bs2 = bs2.at[:, :h4].set(b3b)
    bs2 = bs2.at[:, Q3 + o2_off:Q3 + o2_off + n2].set(b2b)

    # Stage 3: relu(h4) @ [ slab-seg with w3c at lanes o3_off.. ]
    ws3 = jnp.zeros((Q3, SLAB), jnp.float32)
    ws3 = ws3.at[:h4, o3_off:o3_off + n3].set(w3c)
    bs3 = jnp.zeros((1, SLAB), jnp.float32)
    bs3 = bs3.at[:, o3_off:o3_off + n3].set(b3c)

    dims = dict(D=D, n1=n1, n2=n2, n3=n3, h2=h2, h4=h4,
                P2=P2, P3=P3, Q3=Q3, SLAB=SLAB, S1=S1, S2=S2)
    return dict(ws1=ws1.astype(compute_dtype), bs1=bs1,
                ws2=ws2.astype(compute_dtype), bs2=bs2,
                ws3=ws3.astype(compute_dtype), bs3=bs3,
                dims=dims, compute_dtype=compute_dtype)


def classifier_forward(x, packed, *, block_m=1024, out_dtype=jnp.float32):
    """x: (B, D) float32. packed: output of pack_params. Returns (o1, o2, o3) float32.

    out_dtype=jnp.bfloat16 halves the HBM write traffic (acceptable for inference logits).
    """
    d = packed["dims"]
    cdt = packed["compute_dtype"]
    B, D = x.shape
    assert D == d["D"]

    P2, P3, Q3 = d["P2"], d["P3"], d["Q3"]
    SLAB, S1, S2 = d["SLAB"], d["S1"], d["S2"]
    n1, n2, n3 = d["n1"], d["n2"], d["n3"]

    # Row-tile size: multiple of 16 (bf16 sublane packing), no larger than the batch.
    b16 = _ru(B, 16)
    bm = _ru(min(block_m, b16), 16)
    # v7x has 2 TensorCores; make sure the 'parallel' grid axis has >= 2 steps when the
    # batch allows, so both cores get work.
    if bm >= b16 and b16 >= 32:
        bm = max(16, _ru(b16 // 2, 16))
    Bp = _ru(B, bm)

    xin = x.astype(cdt)
    if Bp != B:
        xin = jnp.pad(xin, ((0, Bp - B), (0, 0)))

    def kernel(x_ref, ws1_ref, bs1_ref, ws2_ref, bs2_ref, ws3_ref, bs3_ref, out_ref):
        xt = x_ref[...]                                                    # (bm, D) bf16
        # Stage 1: fused head1 / head2-a / head3-a projections (one MXU pass).
        s1 = jnp.dot(xt, ws1_ref[...], preferred_element_type=jnp.float32) + bs1_ref[...]
        h23 = jnp.maximum(s1[:, :P2 + P3], 0.0)                           # ReLU(h2) || ReLU(h3)
        # Stage 2: block layout (head3-b hidden | head2-b logits) in one MXU pass.
        s2 = jnp.dot(h23.astype(cdt), ws2_ref[...],
                     preferred_element_type=jnp.float32) + bs2_ref[...]
        h4 = jnp.maximum(s2[:, :Q3], 0.0)
        # Stage 3: head3-c logits.
        s3 = jnp.dot(h4.astype(cdt), ws3_ref[...],
                     preferred_element_type=jnp.float32) + bs3_ref[...]
        # Single lane-dense output slab: each stage wrote disjoint lanes (zeros elsewhere),
        # so summing the three whole-vreg output segments assembles [o1 | o2 | o3 | pad].
        slab = s1[:, P2 + P3:] + s2[:, Q3:] + s3
        out_ref[...] = slab.astype(out_ref.dtype)

    def x_map(i):
        return (i, 0)

    def rep_map(i):            # weights / biases replicated across batch tiles
        return (0, 0)

    def full_spec(arr):
        return pl.BlockSpec(arr.shape, rep_map)

    # Working-set estimate -> only raise the scoped VMEM limit when actually needed
    # (v5e default is 16 MiB; cap at 64 MiB which is v7x's physical VMEM).
    weight_bytes = sum(packed[k].size * packed[k].dtype.itemsize
                       for k in ("ws1", "bs1", "ws2", "bs2", "ws3", "bs3"))
    io_bytes = 2 * bm * D * jnp.dtype(cdt).itemsize + 2 * bm * SLAB * jnp.dtype(out_dtype).itemsize
    interm_bytes = 2 * bm * (S1 + S2 + SLAB) * 4 + bm * (P2 + P3 + Q3) * jnp.dtype(cdt).itemsize
    est = weight_bytes + io_bytes + interm_bytes
    vmem_limit = None if est < (12 << 20) else min(_ru(est + (4 << 20), 1 << 20), 64 << 20)

    grid = (Bp // bm,)
    in_specs = [
        pl.BlockSpec((bm, D), x_map),
        full_spec(packed["ws1"]), full_spec(packed["bs1"]),
        full_spec(packed["ws2"]), full_spec(packed["bs2"]),
        full_spec(packed["ws3"]), full_spec(packed["bs3"]),
    ]
    out_spec = pl.BlockSpec((bm, SLAB), x_map)

    slab = pl.pallas_call(
        kernel,
        out_shape=jax.ShapeDtypeStruct((Bp, SLAB), out_dtype),
        grid=grid,
        in_specs=in_specs,
        out_specs=out_spec,
        compiler_params=pltpu.CompilerParams(
            dimension_semantics=("parallel",),
            vmem_limit_bytes=vmem_limit,
        ),
    )(xin, packed["ws1"], packed["bs1"], packed["ws2"], packed["bs2"],
      packed["ws3"], packed["bs3"])

    # Strip batch padding, slice the heads out of the slab, and upcast if needed.
    slab = slab[:B].astype(jnp.float32)
    o1 = slab[:, :n1]
    o2 = slab[:, n1:n1 + n2]
    o3 = slab[:, n1 + n2:n1 + n2 + n3]
    return o1, o2, o3


def reference_forward(x, p, compute_dtype=jnp.float32):
    """Pure-JAX reference; compute_dtype controls the matmul operand precision."""
    def mm(a, w):
        return jnp.dot(a.astype(compute_dtype), w.astype(compute_dtype),
                       preferred_element_type=jnp.float32)
    o1 = mm(x, p["w1"]) + p["b1"]
    h2 = jnp.maximum(mm(x, p["w2a"]) + p["b2a"], 0.0)
    o2 = mm(h2, p["w2b"]) + p["b2b"]
    h3 = jnp.maximum(mm(x, p["w3a"]) + p["b3a"], 0.0)
    h3 = jnp.maximum(mm(h3, p["w3b"]) + p["b3b"], 0.0)
    o3 = mm(h3, p["w3c"]) + p["b3c"]
    return o1, o2, o3


if __name__ == "__main__":
    key = jax.random.PRNGKey(0)
    k_param, k_x = jax.random.split(key)

    # Small shapes: hidden_dim=32 -> D = 64 features; batch = 20 (not a tile multiple,
    # exercises batch padding and the >= 2-step grid split for v7x megacore).
    hidden_dim = 32
    B = 20
    D = hidden_dim * 2

    params = init_params(k_param, hidden_dim=hidden_dim)
    x = jax.random.normal(k_x, (B, D), jnp.float32)

    packed = pack_params(params, compute_dtype=jnp.bfloat16)
    outs = classifier_forward(x, packed)            # default block_m=1024 -> bm=16, 2 grid steps
    outs = jax.block_until_ready(outs)

    ref_bf16 = reference_forward(x, params, compute_dtype=jnp.bfloat16)  # same operand precision
    ref_f32 = reference_forward(x, params, compute_dtype=jnp.float32)    # exact math
    for name, o, rm, rf in zip(("head1", "head2", "head3"), outs, ref_bf16, ref_f32):
        assert o.shape == rf.shape, (name, o.shape, rf.shape)
        assert jnp.allclose(o, rm, atol=1e-2, rtol=1e-2), name
        assert jnp.allclose(o, rf, atol=5e-2, rtol=5e-2), name

    print("KERNEL_OK")
</pallas_src>

<mosaic_0001>
module attributes {stable_mosaic.version = 11 : i64} {
  func.func @kernel(%arg0: i32, %arg1: memref<16x64xbf16, #tpu.memory_space<vmem>>, %arg2: memref<64x384xbf16, #tpu.memory_space<vmem>>, %arg3: memref<1x384xf32, #tpu.memory_space<vmem>>, %arg4: memref<256x256xbf16, #tpu.memory_space<vmem>>, %arg5: memref<1x256xf32, #tpu.memory_space<vmem>>, %arg6: memref<128x128xbf16, #tpu.memory_space<vmem>>, %arg7: memref<1x128xf32, #tpu.memory_space<vmem>>, %arg8: memref<16x128xf32, #tpu.memory_space<vmem>>) attributes {dimension_semantics = [#tpu.dimension_semantics<parallel>], iteration_bounds = array<i64: 2>, scalar_prefetch = 0 : i64, scratch_operands = 0 : i64, tpu.core_type = #tpu.core_type<tc>, window_params = [{transform_indices = @transform_0, window_bounds = array<i64: 16, 64>}, {pipeline_mode = #tpu.pipeline_mode<synchronous>, transform_indices = @transform_1, window_bounds = array<i64: 64, 384>}, {pipeline_mode = #tpu.pipeline_mode<synchronous>, transform_indices = @transform_2, window_bounds = array<i64: 1, 384>}, {pipeline_mode = #tpu.pipeline_mode<synchronous>, transform_indices = @transform_3, window_bounds = array<i64: 256, 256>}, {pipeline_mode = #tpu.pipeline_mode<synchronous>, transform_indices = @transform_4, window_bounds = array<i64: 1, 256>}, {pipeline_mode = #tpu.pipeline_mode<synchronous>, transform_indices = @transform_5, window_bounds = array<i64: 128, 128>}, {pipeline_mode = #tpu.pipeline_mode<synchronous>, transform_indices = @transform_6, window_bounds = array<i64: 1, 128>}, {transform_indices = @transform_7, window_bounds = array<i64: 16, 128>}]} {
    %c0 = arith.constant 0 : index
    %c0_0 = arith.constant 0 : index
    %0 = vector.load %arg1[%c0, %c0_0] : memref<16x64xbf16, #tpu.memory_space<vmem>>, vector<16x64xbf16>
    %c0_1 = arith.constant 0 : index
    %c0_2 = arith.constant 0 : index
    %1 = vector.load %arg2[%c0_1, %c0_2] : memref<64x384xbf16, #tpu.memory_space<vmem>>, vector<64x384xbf16>
    %cst = arith.constant dense<0.000000e+00> : vector<16x384xf32>
    %2 = tpu.matmul %0, %1, %cst {dimension_numbers = #tpu.dot_dimension_numbers<[1], [0], [0], [1], [0, 0, 1, 1], [], []>} : vector<16x64xbf16>, vector<64x384xbf16>, vector<16x384xf32> -> vector<16x384xf32>
    %c0_3 = arith.constant 0 : index
    %c0_4 = arith.constant 0 : index
    %3 = vector.load %arg3[%c0_3, %c0_4] : memref<1x384xf32, #tpu.memory_space<vmem>>, vector<1x384xf32>
    %4 = vector.broadcast %3 : vector<1x384xf32> to vector<16x384xf32>
    %5 = arith.addf %2, %4 : vector<16x384xf32>
    %6 = vector.extract_strided_slice %5 {offsets = [0, 0], sizes = [16, 256], strides = [1, 1]} : vector<16x384xf32> to vector<16x256xf32>
    %cst_5 = arith.constant 0.000000e+00 : f32
    %7 = vector.broadcast %cst_5 : f32 to vector<16x256xf32>
    %8 = arith.maximumf %6, %7 : vector<16x256xf32>
    %9 = arith.truncf %8 : vector<16x256xf32> to vector<16x256xbf16>
    %c0_6 = arith.constant 0 : index
    %c0_7 = arith.constant 0 : index
    %10 = vector.load %arg4[%c0_6, %c0_7] : memref<256x256xbf16, #tpu.memory_space<vmem>>, vector<256x256xbf16>
    %cst_8 = arith.constant dense<0.000000e+00> : vector<16x256xf32>
    %11 = tpu.matmul %9, %10, %cst_8 {dimension_numbers = #tpu.dot_dimension_numbers<[1], [0], [0], [1], [0, 0, 1, 1], [], []>} : vector<16x256xbf16>, vector<256x256xbf16>, vector<16x256xf32> -> vector<16x256xf32>
    %c0_9 = arith.constant 0 : index
    %c0_10 = arith.constant 0 : index
    %12 = vector.load %arg5[%c0_9, %c0_10] : memref<1x256xf32, #tpu.memory_space<vmem>>, vector<1x256xf32>
    %13 = vector.broadcast %12 : vector<1x256xf32> to vector<16x256xf32>
    %14 = arith.addf %11, %13 : vector<16x256xf32>
    %15 = vector.extract_strided_slice %14 {offsets = [0, 0], sizes = [16, 128], strides = [1, 1]} : vector<16x256xf32> to vector<16x128xf32>
    %cst_11 = arith.constant 0.000000e+00 : f32
    %16 = vector.broadcast %cst_11 : f32 to vector<16x128xf32>
    %17 = arith.maximumf %15, %16 : vector<16x128xf32>
    %18 = arith.truncf %17 : vector<16x128xf32> to vector<16x128xbf16>
    %c0_12 = arith.constant 0 : index
    %c0_13 = arith.constant 0 : index
    %19 = vector.load %arg6[%c0_12, %c0_13] : memref<128x128xbf16, #tpu.memory_space<vmem>>, vector<128x128xbf16>
    %cst_14 = arith.constant dense<0.000000e+00> : vector<16x128xf32>
    %20 = tpu.matmul %18, %19, %cst_14 {dimension_numbers = #tpu.dot_dimension_numbers<[1], [0], [0], [1], [0, 0, 1, 1], [], []>} : vector<16x128xbf16>, vector<128x128xbf16>, vector<16x128xf32> -> vector<16x128xf32>
    %c0_15 = arith.constant 0 : index
    %c0_16 = arith.constant 0 : index
    %21 = vector.load %arg7[%c0_15, %c0_16] : memref<1x128xf32, #tpu.memory_space<vmem>>, vector<1x128xf32>
    %22 = vector.broadcast %21 : vector<1x128xf32> to vector<16x128xf32>
    %23 = arith.addf %20, %22 : vector<16x128xf32>
    %24 = vector.extract_strided_slice %5 {offsets = [0, 256], sizes = [16, 128], strides = [1, 1]} : vector<16x384xf32> to vector<16x128xf32>
    %25 = vector.extract_strided_slice %14 {offsets = [0, 128], sizes = [16, 128], strides = [1, 1]} : vector<16x256xf32> to vector<16x128xf32>
    %26 = arith.addf %24, %25 : vector<16x128xf32>
    %27 = arith.addf %26, %23 : vector<16x128xf32>
    %c0_17 = arith.constant 0 : index
    %c0_18 = arith.constant 0 : index
    %28 = vector.load %arg8[%c0_17, %c0_18] : memref<16x128xf32, #tpu.memory_space<vmem>>, vector<16x128xf32>
    tpu.vector_store %arg8[%c0_17, %c0_18], %27 {strides = array<i32>} : memref<16x128xf32, #tpu.memory_space<vmem>>, vector<16x128xf32>,
    return
  }
  func.func @transform_0(%arg0: i32) -> (i32, i32) {
    %c0_i32 = arith.constant 0 : i32
    %c0_i32_0 = arith.constant 0 : i32
    return %arg0, %c0_i32 : i32, i32
  }
  func.func @transform_1(%arg0: i32) -> (i32, i32) {
    %c0_i32 = arith.constant 0 : i32
    %c0_i32_0 = arith.constant 0 : i32
    %c0_i32_1 = arith.constant 0 : i32
    return %c0_i32, %c0_i32_0 : i32, i32
  }
  func.func @transform_2(%arg0: i32) -> (i32, i32) {
    %c0_i32 = arith.constant 0 : i32
    %c0_i32_0 = arith.constant 0 : i32
    %c0_i32_1 = arith.constant 0 : i32
    return %c0_i32, %c0_i32_0 : i32, i32
  }
  func.func @transform_3(%arg0: i32) -> (i32, i32) {
    %c0_i32 = arith.constant 0 : i32
    %c0_i32_0 = arith.constant 0 : i32
    %c0_i32_1 = arith.constant 0 : i32
    return %c0_i32, %c0_i32_0 : i32, i32
  }
  func.func @transform_4(%arg0: i32) -> (i32, i32) {
    %c0_i32 = arith.constant 0 : i32
    %c0_i32_0 = arith.constant 0 : i32
    %c0_i32_1 = arith.constant 0 : i32
    return %c0_i32, %c0_i32_0 : i32, i32
  }
  func.func @transform_5(%arg0: i32) -> (i32, i32) {
    %c0_i32 = arith.constant 0 : i32
    %c0_i32_0 = arith.constant 0 : i32
    %c0_i32_1 = arith.constant 0 : i32
    return %c0_i32, %c0_i32_0 : i32, i32
  }
  func.func @transform_6(%arg0: i32) -> (i32, i32) {
    %c0_i32 = arith.constant 0 : i32
    %c0_i32_0 = arith.constant 0 : i32
    %c0_i32_1 = arith.constant 0 : i32
    return %c0_i32, %c0_i32_0 : i32, i32
  }
  func.func @transform_7(%arg0: i32) -> (i32, i32) {
    %c0_i32 = arith.constant 0 : i32
    %c0_i32_0 = arith.constant 0 : i32
    return %arg0, %c0_i32 : i32, i32
  }
}

</mosaic_0001>

<bundles_post_ra>
// kernel: tpu_custom_call.1
= control target key start
LH: loop header
LB: loop body
LE: loop exit
PB: predicated region body
PF: predicated region fallthrough
CT: control target
= control target key end

     0   :  { %s1786_s0 = inlined_call_operand.hbm [shape: bf16[32,64], index: 0, kind: input, shape index: {}]   ;;  %s1787_s1 = inlined_call_operand.hbm [shape: bf16[64,384], index: 1, kind: input, shape index: {}]   ;;  %s1788_s2 = inlined_call_operand.vmem [shape: f32[1,384], index: 2, kind: input, shape index: {}]   ;;  %s1789_s3 = inlined_call_operand.hbm [shape: bf16[256,256], index: 3, kind: input, shape index: {}]   ;;  %s1790_s4 = inlined_call_operand.vmem [shape: f32[1,256], index: 4, kind: input, shape index: {}]   ;;  %s1791_s5 = inlined_call_operand.hbm [shape: bf16[128,128], index: 5, kind: input, shape index: {}]   ;;  %s1792_s6 = inlined_call_operand.vmem [shape: f32[1,128], index: 6, kind: input, shape index: {}]   ;;  %s1793_s7 = inlined_call_operand.hbm [shape: f32[32,128], index: 7, kind: output, shape index: {}]  }
   0x1   :  { %1800 = sst [smem:[#allocation15_spill]] %s1787_s1 }
   0x2   :  { %12 = vsyncpa [#allocation3], 0 }
   0x3   :  { %14 = vsyncpa [#allocation3 + $0x1], 0 }
   0x4   :  { %15 = vsyncpa [#allocation6], 0 }
   0x5   :  { %16 = vsyncpa [#allocation9], 0 }
   0x6   :  { %17 = vsyncpa [#allocation4], 0 }
   0x7   :  { %19 = vsyncpa [#allocation4 + $0x1], 0  ;;  %s1547_s24 = smov 0   ;;  %s1549_s25 = smov 0  }
   0x8   :  { %s1551_s26 = smov 0   ;;  %s1553_s27 = smov 0  }
   0x9 LB: > { %s1568_s28 = sadd.s32 4294967295, %s1489_s27   ;;  %s1026_s29 = sadd.s32 4294967294, %s1489_s27   ;;  %s1489_s27 = sphi %s1553_s27, %s1823_s27   ;;  %s1485_s26 = sphi %s1551_s26, %s1822_s26   ;;  %s1481_s25 = sphi %s1549_s25, %s1821_s25   ;;  %s1477_s24 = sphi %s1547_s24, %s1820_s24  }
   0xa   : > { %p45_p0 = scmp.ne.s32.totalorder %s1481_s25, %s1477_s24  ;;  %p1794_p1 = scmp.eq.s32.totalorder %s1568_s28, 0 }
   0xb   : > { %p201_p3 = scmp.eq.s32.totalorder %s1026_s29, 1  ;;  %p1027_p5 = scmp.ge.s32.totalorder %s1489_s27, 1 }
   0xc   : > { %p1577_p4 = por %p1794_p1, %p45_p0  ;;  %p208_p7 = scmp.lt.s32.totalorder %s1489_s27, 3 }
   0xd   : > { %p1582_p6 = por %p201_p3, %p45_p0  ;;  %s1491_s10 = smov [#allocation5]  }
   0xe   : > { %s1801_s30 = scalar_select %p1577_p4, 1, 0 }
   0xf   : > { %s1802_s8 = scalar_select %p1582_p6, 1, 0 }
  0x10   : > { %p1587_p8 = pnand %p1027_p5, %p208_p7  ;;  %s220_s11 = sshll.u32 %s1491_s10, 4  ;;  %s221_s11 = int_to_ptr.vmem [resolvable:$true] %s220_s11 }
  0x11   : > { %s1492_s13 = smov [#allocation7]   ;;  %s1322_s15 = scalar_lea.vmem %s221_s11, 1536 }
  0x12   : > { %s1803_s9 = scalar_select %p1587_p8, 1, 0 }
  0x13   : > { %p1166_p9 = pneg %p1587_p8  ;;  %s236_s14 = sshll.u32 %s1492_s13, 4  ;;  %s237_s14 = int_to_ptr.vmem [resolvable:$true] %s236_s14 }
  0x14   : > { %p1323_p13 = scmp.ne.s32.totalorder %s221_s11, %s1322_s15  ;;  %p1330_p5 = scmp.lt.s32.totalorder %s221_s11, %s221_s11 }
  0x15   : > { %p1596_p11 = pnand %p1166_p9, %p1794_p1  ;;  %p1331_p7 = scmp.lt.s32.totalorder %s1322_s15, %s1322_s15 }
  0x17   : > { %p1313_p12 = pneg %p1596_p11  ;;  %p1332_p10 = por %p1331_p7, %p1330_p5 }
  0x19   : > { %p1325_p0 = pnand %p1323_p13, %p1313_p12 }
  0x1b   : > { %p1326_p3 = pneg %p1325_p0 }
  0x1d   : > { %p1333_p9 = pnand %p1332_p10, %p1326_p3 }
  0x1f   : > { %1336 = shalt.err (!%p1333_p9)
}
  0x20   : > { %s1493_s16 = smov 192   ;;  %s1494_s17 = smov 12  }
  0x21   : > { %s1805_s1 = sld [smem:[#allocation15_spill]]  ;;  %s1348_s20 = scalar_lea.vmem %s237_s14, 4096 }
  0x22   : > { %p1349_p1 = scmp.ne.s32.totalorder %s237_s14, %s1348_s20  ;;  %p1356_p2 = scmp.lt.s32.totalorder %s237_s14, %s237_s14 }
  0x23   : > { %p1357_p6 = scmp.lt.s32.totalorder %s1348_s20, %s1348_s20 }
  0x24   : > { %p1351_p13 = pnand %p1349_p1, %p1313_p12 }
  0x25   : > { %p1358_p5 = por %p1357_p6, %p1356_p2 }
  0x26   : > { %p1352_p0 = pneg %p1351_p13 }
  0x27   : > { %1169 = dma.hbm_to_vmem [thread:$0]  (!%p1596_p11), %s1805_s1, 1536, %s221_s11, [#allocation6], %s1493_s16, %s1493_s16, %s1494_s17  }
  0x28   : > { %p1359_p10 = pnand %p1358_p5, %p1352_p0 }
  0x2a   : > { %1362 = shalt.err (!%p1359_p10)
}
  0x2b   : > { %s1495_s21 = smov 128   ;;  %s1496_s22 = smov 8  }
  0x2c   : > { %1172 = dma.hbm_to_vmem [thread:$0]  (!%p1596_p11), %s1789_s3, 4096, %s237_s14, [#allocation6], %s1495_s21, %s1495_s21, %s1496_s22  }
  0x2d   : > { %s1497_s10 = smov [#allocation8]  }
  0x2e   : > { %s252_s11 = sshll.u32 %s1497_s10, 4  ;;  %s253_s11 = int_to_ptr.vmem [resolvable:$true] %s252_s11 }
  0x2f   : > { %s1374_s13 = scalar_lea.vmem %s253_s11, 1024  ;;  %p1382_p6 = scmp.lt.s32.totalorder %s253_s11, %s253_s11 }
  0x30   : > { %p1375_p1 = scmp.ne.s32.totalorder %s253_s11, %s1374_s13  ;;  %p1383_p7 = scmp.lt.s32.totalorder %s1374_s13, %s1374_s13 }
  0x32   : > { %p1377_p3 = pnand %p1375_p1, %p1313_p12  ;;  %p1384_p9 = por %p1383_p7, %p1382_p6 }
  0x34   : > { %p1378_p2 = pneg %p1377_p3 }
  0x36   : > { %p1385_p13 = pnand %p1384_p9, %p1378_p2 }
  0x38   : > { %1388 = shalt.err (!%p1385_p13)
}
  0x39   : > { %s1795_s15 = smov 64   ;;  %s1796_s14 = smov 4  }
  0x3a   : > { %1175 = dma.hbm_to_vmem [thread:$0]  (!%p1596_p11), %s1791_s5, 1024, %s253_s11, [#allocation9], %s1795_s15, %s1795_s15, %s1796_s14  }
  0x3b   : > { %s1630_s18 = sadd.s32 1, %s1489_s27   ;;  %s32_s20 = sadd.s32 1, %s1485_s26 }
  0x3c   : > { %s29_s19 = ssub.s32 %s1489_s27, %s1630_s18  ;;  %p39_p0 = scmp.ne.s32.totalorder %s1485_s26, %s1481_s25 }
  0x3d   : > { %p30_p12 = scmp.eq.s32.totalorder %s29_s19, 0  ;;  %p40_p5 = scmp.eq.s32.totalorder %s1489_s27, 0 }
  0x3e   : > { %p1187_p10 = scmp.lt.s32.totalorder %s1489_s27, 2  ;;  %p1806_p3 = scmp.eq.s32.totalorder %s1568_s28, 1 }
  0x3f   : > { %s1640_s21 = scalar_select %p30_p12, %s1485_s26, %s32_s20  }
  0x40   : > { %p41_p1 = por %p40_p5, %p39_p0  ;;  %p1644_p2 = por %p1806_p3, %p39_p0 }
  0x41   : > { %s269_s22 = sand.u32 1, %s1485_s26   ;;  %s1102_s23 = sshll.u32 %s1489_s27, 7 }
  0x42   : > { %s1807_s12 = scalar_select %p1644_p2, 1, 0 }
  0x43   : > { %s1032_s29 = sshll.u32 %s269_s22, 3  ;;  %s1653_s13 = scalar_lea.hbm %s1786_s0, %s1102_s23 }
  0x44   : > { %s273_s16 = scalar_lea.vmem [#allocation2], %s1032_s29  ;;  %p1655_p11 = pnand %p1187_p10, %p41_p1 }
  0x45   : > { %s280_s17 = sshll.u32 %s273_s16, 4  ;;  %s1661_s20 = scalar_lea.sflag [#allocation3], %s269_s22  ;;  %s1659_s17 = int_to_ptr.vmem [resolvable:$true] %s280_s17 }
  0x46   : > { %s1389_s15 = scalar_lea.hbm %s1653_s13, 128  ;;  %p1391_p7 = pneg %p1655_p11 }
  0x47   : > { %p1390_p6 = scmp.ne.s32.totalorder %s1653_s13, %s1389_s15  ;;  %s1394_s29 = scalar_lea.hbm %s1786_s0, 256 }
  0x48   : > { %p1395_p12 = scmp.lt.s32.totalorder %s1653_s13, %s1786_s0  ;;  %p1396_p0 = scmp.lt.s32.totalorder %s1394_s29, %s1389_s15 }
  0x49   : > { %p1392_p9 = pnand %p1391_p7, %p1390_p6 }
  0x4a   : > { %p1397_p5 = por %p1396_p0, %p1395_p12 }
  0x4b   : > { %p1393_p13 = pneg %p1392_p9 }
  0x4d   : > { %p1398_p10 = pnand %p1397_p5, %p1393_p13 }
  0x4f   : > { %1401 = shalt.err (!%p1398_p10)
}
  0x50   : > { %s1402_s22 = scalar_lea.vmem %s1659_s17, 128  ;;  %s1500_s14 = smov [#allocation2]  }
  0x51   : > { %p1403_p1 = scmp.ne.s32.totalorder %s1659_s17, %s1402_s22  ;;  %s1407_s1 = sshll.u32 %s1500_s14, 4  ;;  %s1408_s1 = int_to_ptr.vmem [resolvable:$false] %s1407_s1 }
  0x52   : > { %s1409_s23 = scalar_lea.vmem %s1408_s1, 256  ;;  %p1410_p9 = scmp.lt.s32.totalorder %s1659_s17, %s1408_s1 }
  0x53   : > { %p1405_p3 = pnand %p1403_p1, %p1391_p7  ;;  %p1411_p2 = scmp.lt.s32.totalorder %s1409_s23, %s1402_s22 }
  0x55   : > { %p1406_p6 = pneg %p1405_p3  ;;  %p1412_p4 = por %p1411_p2, %p1410_p9 }
  0x57   : > { %p1413_p8 = pnand %p1412_p4, %p1406_p6 }
  0x59   : > { %1416 = shalt.err (!%p1413_p8)
}
  0x5a   : > { %s1809_s15 = smov 4   ;;  %s1810_s10 = smov 64  }
  0x5b   : > { %1179 = dma.hbm_to_vmem [thread:$0]  (!%p1655_p11), %s1653_s13, 128, %s1659_s17, %s1661_s20, %s1810_s10, %s1810_s10, %s1809_s15  }
  0x5c   : > { %p1811_p7 = scmp.ne.s32.totalorder %s1803_s9, 0 }
  0x5d   : > { %s1688_s14 = sand.u32 (!%p1811_p7), 1, %s1481_s25   ;;  %p1812_p4 = scmp.ne.s32.totalorder (!%p1811_p7), %s1801_s30, 0 }
  0x5e   : > { %292 = sbr.rel (%p1811_p7) target bundleno = 748 (0x2ec), region = 48  ;;  %s1036_s1 = sshll.u32 (!%p1811_p7), %s1688_s14, 3 }
  0x5f   : > { %s295_s29 = scalar_lea.sflag (!%p1811_p7), [#allocation3], %s1688_s14  ;;  %s1692_s11 = scalar_lea.vmem (!%p1811_p7), [#allocation2], %s1036_s1 }
  0x63   : > { %1460 = dma.done.wait (%p1812_p4), %s295_s29, 128  }
  0x64   : > { %1462 = vsyncadd (%p1812_p4), %s295_s29, 4294967168  ;;  %p1813_p8 = scmp.eq.s32.totalorder %s1568_s28, 0 }
  0x66   : > { %1464 = dma.done.wait (%p1813_p8), [#allocation6], 5632   ;;  %p1814_p2 = pmov %p1813_p8 }
  0x68   : > { %1466 = vsyncadd (%p1814_p2), [#allocation6], 4294961664  ;;  %p1815_p11 = pmov %p1814_p2 }
  0x69   : > { %p1816_p13 = pmov %p1814_p2 }
  0x6a   : > { %1468 = dma.done.wait (%p1815_p11), [#allocation9], 1024  }
  0x6b   : > { %1470 = vsyncadd (%p1816_p13), [#allocation9], 4294966272  ;;  %v1501_v0 = vmov 0   ;;  %v1238_v1 = vld [vmem:[#allocation5 + $0x4c] ss:$12 sps:$4 sm:$0xff]   ;;  %vm448_vm0 = vcmask 523264   ;;  %v364_v52 = vlaneseq }
  0x6c   : > { %484 = vmatprep.mubr.bf16.mxu1 %v1501_v0  ;;  %v1240_v2 = vld [vmem:[#allocation5 + $0x48] ss:$12 sps:$4 sm:$0xff]   ;;  %460 = vmatprep.subr.bf16.mxu1 %v1238_v1  ;;  %v1243_v4 = vld [vmem:[#allocation5 + $0x30] ss:$12 sps:$4 sm:$0xff]   ;;  %v1246_v6 = vld [vmem:[#allocation5 + $0x18] ss:$12 sps:$4 sm:$0xff]  }
  0x6d   : > { %v1241_v3 = vld [vmem:[#allocation5 + $0x34] ss:$12 sps:$4 sm:$0xff]   ;;  %461 = vmatpush1.bf16.msra.mxu1 %v1240_v2  ;;  %v1244_v5 = vld [vmem:[#allocation5 + $0x1c] ss:$12 sps:$4 sm:$0xff]   ;;  %v1253_v8 = vld [vmem:[#allocation7 + $0x70] ss:$8 sps:$4 sm:$0xff]  }
  0x6e   : > { %462 = vmatprep.subr.bf16.mxu1 %v1241_v3  ;;  %v1251_v7 = vld [vmem:[#allocation7 + $0x74] ss:$8 sps:$4 sm:$0xff]   ;;  %v1247_v9 = vld [vmem:[#allocation5 + $0x4] ss:$12 sps:$4 sm:$0xff]   ;;  %v1256_v11 = vld [vmem:[#allocation7 + $0x60] ss:$8 sps:$4 sm:$0xff]  }
  0x6f   : > { %v1254_v10 = vld [vmem:[#allocation7 + $0x64] ss:$8 sps:$4 sm:$0xff]   ;;  %746 = vmatprep.subr.bf16.mxu0 %v1251_v7  ;;  %v1257_v13 = vld [vmem:[#allocation7 + $0x54] ss:$8 sps:$4 sm:$0xff]   ;;  %v1259_v15 = vld [vmem:[#allocation7 + $0x50] ss:$8 sps:$4 sm:$0xff]  }
  0x70   : > { %747 = vmatpush1.bf16.msra.mxu0 %v1253_v8  ;;  %v1249_v12 = vld [vmem:[#allocation5] ss:$12 sps:$4 sm:$0xff]   ;;  %v1707_v14 = vld [vmem:[%s1692_s11] sm:$0xff]   ;;  %v1502_v37 = vmov 0.0   ;;  %vm1503_vm1 = vmmov 0   ;;  %v365_v53 = vshrl.u32 %v364_v52, 7 }
  0x71   : > { %463 = vmatpush1.bf16.msra.mxu1 %v1243_v4  ;;  %748 = vmatprep.subr.bf16.mxu0 %v1254_v10  ;;  %v1260_v16 = vld [vmem:[#allocation7 + $0x44] ss:$8 sps:$4 sm:$0xff]   ;;  %v1262_v17 = vld [vmem:[#allocation7 + $0x40] ss:$8 sps:$4 sm:$0xff]   ;;  %v1263_v18 = vld [vmem:[#allocation7 + $0x34] ss:$8 sps:$4 sm:$0xff]  }
  0x72   : > { %464 = vmatprep.subr.bf16.mxu1 %v1244_v5  ;;  %v1265_v19 = vld [vmem:[#allocation7 + $0x30] ss:$8 sps:$4 sm:$0xff]   ;;  %v1266_v20 = vld [vmem:[#allocation7 + $0x24] ss:$8 sps:$4 sm:$0xff]   ;;  %v1268_v21 = vld [vmem:[#allocation7 + $0x20] ss:$8 sps:$4 sm:$0xff]  }
  0x73   : > { %v1269_v22 = vld [vmem:[#allocation7 + $0x14] ss:$8 sps:$4 sm:$0xff]   ;;  %v1271_v23 = vld [vmem:[#allocation7 + $0x10] ss:$8 sps:$4 sm:$0xff]   ;;  %v1272_v24 = vld [vmem:[#allocation7 + $0x4] ss:$8 sps:$4 sm:$0xff]  }
  0x74   : > { %749 = vmatpush1.bf16.msra.mxu0 %v1256_v11  ;;  %v1274_v25 = vld [vmem:[#allocation7] ss:$8 sps:$4 sm:$0xff]   ;;  %v1275_v26 = vld [vmem:[#allocation7 + $0xf4] ss:$8 sps:$4 sm:$0xff]   ;;  %v1277_v27 = vld [vmem:[#allocation7 + $0xf0] ss:$8 sps:$4 sm:$0xff]  }
  0x75   : > { %465 = vmatpush1.bf16.msra.mxu1 %v1246_v6  ;;  %750 = vmatprep.subr.bf16.mxu0 %v1257_v13  ;;  %v1278_v28 = vld [vmem:[#allocation7 + $0xe4] ss:$8 sps:$4 sm:$0xff]   ;;  %v1280_v29 = vld [vmem:[#allocation7 + $0xe0] ss:$8 sps:$4 sm:$0xff]   ;;  %v1281_v30 = vld [vmem:[#allocation7 + $0xd4] ss:$8 sps:$4 sm:$0xff]  }
  0x76   : > { %466 = vmatprep.subr.bf16.mxu1 %v1247_v9  ;;  %v1283_v31 = vld [vmem:[#allocation7 + $0xd0] ss:$8 sps:$4 sm:$0xff]   ;;  %v1284_v32 = vld [vmem:[#allocation7 + $0xc4] ss:$8 sps:$4 sm:$0xff]   ;;  %v1286_v33 = vld [vmem:[#allocation7 + $0xc0] ss:$8 sps:$4 sm:$0xff]  }
  0x77   : > { %v1287_v34 = vld [vmem:[#allocation7 + $0xb4] ss:$8 sps:$4 sm:$0xff]   ;;  %v1289_v35 = vld [vmem:[#allocation7 + $0xb0] ss:$8 sps:$4 sm:$0xff]   ;;  %v1291_v38 = vld [vmem:[#allocation7 + $0xa4] ss:$8 sps:$4 sm:$0xff]  }
  0x78   : > { %751 = vmatpush1.bf16.msra.mxu0 %v1259_v15  ;;  %v1290_v36 = vld [vmem:[#allocation5 + $0x50] ss:$12 sps:$4 sm:$0xff]   ;;  %v1293_v39 = vld [vmem:[#allocation7 + $0xa0] ss:$8 sps:$4 sm:$0xff]   ;;  %v1294_v40 = vld [vmem:[#allocation5 + $0x38] ss:$12 sps:$4 sm:$0xff]  }
  0x79   : > { %467 = vmatpush1.bf16.msra.mxu1 %v1249_v12  ;;  %752 = vmatprep.subr.bf16.mxu0 %v1260_v16  ;;  %v1295_v41 = vld [vmem:[#allocation7 + $0x94] ss:$8 sps:$4 sm:$0xff]   ;;  %v1297_v42 = vld [vmem:[#allocation7 + $0x90] ss:$8 sps:$4 sm:$0xff]   ;;  %v1298_v43 = vld [vmem:[#allocation5 + $0x20] ss:$12 sps:$4 sm:$0xff]  }
  0x7a   : > { %1118 = vmatprep.subr.bf16.mxu1 %v1502_v37  ;;  %v1299_v44 = vld [vmem:[#allocation7 + $0x84] ss:$8 sps:$4 sm:$0xff]   ;;  %v1301_v45 = vld [vmem:[#allocation7 + $0x80] ss:$8 sps:$4 sm:$0xff]   ;;  %v1303_v47 = vld [vmem:[#allocation8 + $0x38] sm:$0xff]   ;;  %v370_v54 = vsub.s32 1, %v365_v53 }
  0x7b   : > { %v1302_v46 = vld [vmem:[#allocation5 + $0x8] ss:$12 sps:$4 sm:$0xff]   ;;  %v1306_v50 = vld [vmem:[#allocation8 + $0x20] sm:$0xff]   ;;  %v1307_v51 = vld [vmem:[#allocation8 + $0x18] sm:$0xff]   ;;  %v366_v55 = vsub.s32 0, %v365_v53  ;;  %v374_v16 = vsub.s32 2, %v365_v53 }
  0x7c   : > { %1054 = vmatmul.mubr.msk.bf16.vlgmr.msra.gmra.mxu1 %vm448_vm0, %v1707_v14  ;;  %753 = vmatpush1.bf16.msra.mxu0 %v1262_v17  ;;  %v1304_v48 = vld [vmem:[#allocation8 + $0x30] sm:$0xff]   ;;  %v1305_v49 = vld [vmem:[#allocation8 + $0x28] sm:$0xff]   ;;  %s1040_s19 = sshll.u32 %s1688_s14, 4  ;;  %s1103_s15 = sshll.u32 %s1568_s28, 8 }
  0x7d   : > { %754 = vmatprep.subr.bf16.mxu0 %v1263_v18  ;;  %1119 = vmatpush3.bf16.msra.mxu1 %v1290_v36  ;;  %v362_v56 = vld [vmem:[%s1788_s2] sm:$0x7]  ;;  %v1309_v11 = vld [vmem:[#allocation8 + $0x8] sm:$0xff]   ;;  %s340_s22 = scalar_lea.vmem [#allocation10], %s1040_s19  ;;  %s1743_s29 = scalar_lea.hbm %s1793_s7, %s1103_s15 }
  0x7e   : > { %1120 = vmatprep.subr.bf16.mxu1 %v1502_v37  ;;  %1126 = vmatprep.mubr.msk.bf16.mxu1 %vm1503_vm1, %v1502_v37  ;;  %v371_v58 = vrot.slane %v362_v56, %v370_v54  ;;  %v367_v59 = vrot.slane %v362_v56, %v366_v55  ;;  %v1308_v9 = vld [vmem:[#allocation8 + $0x10] sm:$0xff]   ;;  %v375_v18 = vrot.slane %v362_v56, %v374_v16  ;;  %s924_s23 = sshll.u32 %s340_s22, 4  ;;  %s911_s11 = scalar_lea.sflag [#allocation4], %s1688_s14  ;;  %s1738_s23 = int_to_ptr.vmem [resolvable:$true] %s924_s23 }
  0x7f   : > { %v574_v17 = vld [vmem:[%s1790_s4] sm:$0x3]  ;;  %s1417_s30 = scalar_lea.vmem %s1738_s23, 256  ;;  %p1817_p0 = scmp.ne.s32.totalorder %s1807_s12, 0 }
  0x80   : > { %755 = vmatpush1.bf16.msra.mxu0 %v1265_v19  ;;  %v579_v19 = vrot.slane %v574_v17, %v366_v55  ;;  %p1418_p12 = scmp.ne.s32.totalorder %s1738_s23, %s1417_s30  ;;  %s1504_s28 = smov [#allocation10]  }
  0x81   : > { %756 = vmatprep.subr.bf16.mxu0 %v1266_v20  ;;  %1121 = vmatpush3.bf16.msra.mxu1 %v1294_v40  ;;  %v583_v20 = vrot.slane %v574_v17, %v370_v54  ;;  %s1421_s9 = sshll.u32 %s1504_s28, 4  ;;  %s1422_s9 = int_to_ptr.vmem [resolvable:$false] %s1421_s9 }
  0x82   : > { %1122 = vmatprep.subr.bf16.mxu1 %v1502_v37  ;;  %p1419_p5 = pnand %p1418_p12, %p1817_p0  ;;  %s1423_s13 = scalar_lea.vmem %s1422_s9, 512 }
  0x83   : > { %p1424_p1 = scmp.lt.s32.totalorder %s1738_s23, %s1422_s9  ;;  %p1425_p3 = scmp.lt.s32.totalorder %s1423_s13, %s1417_s30 }
  0x84   : > { %757 = vmatpush1.bf16.msra.mxu0 %v1268_v21  ;;  %p1420_p10 = pneg %p1419_p5 }
  0x85   : > { %758 = vmatprep.subr.bf16.mxu0 %v1269_v22  ;;  %1123 = vmatpush3.bf16.msra.mxu1 %v1298_v43  ;;  %p1426_p6 = por %p1425_p3, %p1424_p1 }
  0x86   : > { %1124 = vmatprep.subr.bf16.mxu1 %v1502_v37 }
  0x87   : > { %p1427_p9 = pnand %p1426_p6, %p1420_p10 }
  0x88   : > { %759 = vmatpush1.bf16.msra.mxu0 %v1271_v23 }
  0x89   : > { %760 = vmatprep.subr.bf16.mxu0 %v1272_v24  ;;  %1125 = vmatpush3.bf16.msra.mxu1 %v1302_v46 }
  0x8a   : > { %1130 = vmatprep.subr.bf16.mxu1 %v1502_v37 }
  0x8c   : > { %761 = vmatpush1.bf16.msra.mxu0 %v1274_v25  ;;  %1127 = vmatmul.mubr.msk.bf16.vlgmr.msra.gmra.mxu1 %vm448_vm0, %v1707_v14  ;;  %v1310_v14 = vld [vmem:[#allocation8] sm:$0xff]  }
  0x8d   : > { %762 = vmatprep.subr.bf16.mxu0 %v1275_v26  ;;  %1131 = vmatpush3.bf16.msra.mxu1 %v1303_v47 }
  0x8e   : > { %1146 = vmatprep.mubr.msk.bf16.mxu1 %vm1503_vm1, %v1502_v37  ;;  %1132 = vmatprep.subr.bf16.mxu1 %v1502_v37 }
  0x90   : > { %763 = vmatpush2.bf16.msra.mxu0 %v1277_v27 }
  0x91   : > { %764 = vmatprep.subr.bf16.mxu0 %v1278_v28  ;;  %1133 = vmatpush3.bf16.msra.mxu1 %v1304_v48 }
  0x92   : > { %1134 = vmatprep.subr.bf16.mxu1 %v1502_v37 }
  0x94   : > { %765 = vmatpush2.bf16.msra.mxu0 %v1280_v29 }
  0x95   : > { %766 = vmatprep.subr.bf16.mxu0 %v1281_v30  ;;  %1135 = vmatpush3.bf16.msra.mxu1 %v1305_v49 }
  0x96   : > { %1136 = vmatprep.subr.bf16.mxu1 %v1502_v37 }
  0x98   : > { %767 = vmatpush2.bf16.msra.mxu0 %v1283_v31 }
  0x99   : > { %768 = vmatprep.subr.bf16.mxu0 %v1284_v32  ;;  %1137 = vmatpush3.bf16.msra.mxu1 %v1306_v50 }
  0x9a   : > { %1138 = vmatprep.subr.bf16.mxu1 %v1502_v37 }
  0x9c   : > { %769 = vmatpush2.bf16.msra.mxu0 %v1286_v33  ;;  %v1088_v33 = vld [vmem:[%s1792_s6] ss:$0 sm:$0xff] }
  0x9d   : > { %770 = vmatprep.subr.bf16.mxu0 %v1287_v34  ;;  %1139 = vmatpush3.bf16.msra.mxu1 %v1307_v51 }
  0x9e   : > { %1140 = vmatprep.subr.bf16.mxu1 %v1502_v37 }
  0xa0   : > { %771 = vmatpush2.bf16.msra.mxu0 %v1289_v35 }
  0xa1   : > { %772 = vmatprep.subr.bf16.mxu0 %v1291_v38  ;;  %1141 = vmatpush3.bf16.msra.mxu1 %v1308_v9 }
  0xa2   : > { %1142 = vmatprep.subr.bf16.mxu1 %v1502_v37 }
  0xa4   : > { %773 = vmatpush2.bf16.msra.mxu0 %v1293_v39 }
  0xa5   : > { %774 = vmatprep.subr.bf16.mxu0 %v1295_v41  ;;  %1143 = vmatpush3.bf16.msra.mxu1 %v1309_v11 }
  0xa6   : > { %1144 = vmatprep.subr.bf16.mxu1 %v1502_v37 }
  0xa8   : > { %775 = vmatpush2.bf16.msra.mxu0 %v1297_v42 }
  0xa9   : > { %776 = vmatprep.subr.bf16.mxu0 %v1299_v44  ;;  %1145 = vmatpush3.bf16.msra.mxu1 %v1310_v14 }
  0xac   : > { %777 = vmatpush2.bf16.msra.mxu0 %v1301_v45 }
 0x13c   : > { %v486_v57 = vpop.f32.mrf.mxu1 }
 0x13d   : > { %v487_v0 = vadd.f32 %v486_v57, %v367_v59 }
 0x13e   : > { %v488_v60 = vpop.f32.mrf.mxu1 }
 0x13f   : > { %v489_v62 = vadd.f32 %v488_v60, %v371_v58  ;;  %v536_v6 = vmax.f32 %v487_v0, 0.0 }
 0x140   : > { %v490_v61 = vpop.f32.mrf.mxu1 }
 0x141   : > { %v491_v63 = vadd.f32 %v490_v61, %v367_v59  ;;  %v537_v4 = vmax.f32 %v489_v62, 0.0 }
 0x142   : > { %v492_v1 = vpop.f32.mrf.mxu1 }
 0x143   : > { %v493_v2 = vadd.f32 %v492_v1, %v371_v58  ;;  %v538_v3 = vmax.f32 %v491_v63, 0.0 }
 0x145   : > { %v539_v5 = vmax.f32 %v493_v2, 0.0  ;;  %v540_v8 = vpack.c.bf16 %v538_v3, %v536_v6 }
 0x147   : > { %v541_v7 = vpack.c.bf16 %v539_v5, %v537_v4 }
 0x149   : > { %778 = vmatprep.mubr.bf16.mxu0 %v541_v7 }
 0x14a   : > { %779 = vmatmul.mubr.bf16.vlgmr.msra.gmra.mxu0 %v540_v8 }
 0x14c   : > { %v529_v10 = vpop.f32.mrf.mxu1 }
 0x14d   : > { %v530_v22 = vadd.f32 %v529_v10, %v375_v18 }
 0x14e   : > { %v1128_v12 = vpop.f32.mrf.mxu1 }
 0x150   : > { %v532_v13 = vpop.f32.mrf.mxu1 }
 0x151   : > { %v533_v35 = vadd.f32 %v532_v13, %v375_v18 }
 0x152   : > { %v1129_v15 = vpop.f32.mrf.mxu1 }
 0x20a   : > { %v780_v21 = vpop.f32.mrf.mxu0 }
 0x20b   : > { %v781_v24 = vadd.f32 %v780_v21, %v579_v19 }
 0x20c   : > { %v782_v23 = vpop.f32.mrf.mxu0 }
 0x20d   : > { %v783_v25 = vadd.f32 %v782_v23, %v583_v20  ;;  %v789_v29 = vmax.f32 %v781_v24, 0.0 }
 0x20e   : > { %v784_v26 = vpop.f32.mrf.mxu0 }
 0x20f   : > { %v904_v27 = vadd.f32 %v783_v25, %v530_v22  ;;  %v785_v28 = vadd.f32 %v784_v26, %v579_v19 }
 0x210   : > { %v786_v32 = vpop.f32.mrf.mxu0 }
 0x211   : > { %v790_v30 = vmax.f32 %v785_v28, 0.0  ;;  %v787_v36 = vadd.f32 %v786_v32, %v583_v20 }
 0x213   : > { %v791_v31 = vpack.c.bf16 %v790_v30, %v789_v29  ;;  %v905_v41 = vadd.f32 %v787_v36, %v533_v35 }
 0x215   : > { %1147 = vmatmul.mubr.bf16.vlgmr.msra.gmra.mxu1 %v791_v31 }
 0x2d5   : > { %v897_v34 = vpop.f32.mrf.mxu1 }
 0x2d6   : > { %v898_v37 = vadd.f32 %v1088_v33, %v897_v34 }
 0x2d7   : > { %v1148_v38 = vpop.f32.mrf.mxu1 }
 0x2d8   : > { %v906_v39 = vadd.f32 %v904_v27, %v898_v37 }
 0x2d9   : > { %v900_v40 = vpop.f32.mrf.mxu1 }
 0x2da   : > { %908 = vst [vmem:[%s340_s22] sm:$0xff] %v906_v39  ;;  %v901_v42 = vadd.f32 %v1088_v33, %v900_v40 }
 0x2db   : > { %v1149_v43 = vpop.f32.mrf.mxu1 }
 0x2dc   : > { %v907_v44 = vadd.f32 %v905_v41, %v901_v42 }
 0x2de   : > { %909 = vst [vmem:[%s340_s22 + $0x8] sm:$0xff] %v907_v44 }
 0x2df   : > { %1430 = shalt.err (!%p1427_p9)
}
 0x2e0   : > { %s1431_s17 = scalar_lea.hbm %s1743_s29, 256  ;;  %s1435_s16 = scalar_lea.hbm %s1793_s7, 512 }
 0x2e1   : > { %p1432_p7 = scmp.ne.s32.totalorder %s1743_s29, %s1431_s17  ;;  %p1436_p2 = scmp.lt.s32.totalorder %s1743_s29, %s1793_s7 }
 0x2e2   : > { %p1437_p11 = scmp.lt.s32.totalorder %s1435_s16, %s1431_s17 }
 0x2e3   : > { %p1433_p4 = pnand %p1432_p7, %p1817_p0 }
 0x2e4   : > { %p1438_p13 = por %p1437_p11, %p1436_p2 }
 0x2e5   : > { %p1434_p8 = pneg %p1433_p4 }
 0x2e7   : > { %p1439_p12 = pnand %p1438_p13, %p1434_p8 }
 0x2e9   : > { %1442 = shalt.err (!%p1439_p12)
}
 0x2ea   : > { %s1505_s10 = smov 128   ;;  %s1506_s1 = smov 8  }
 0x2eb   : > { %1164 = dma.vmem_to_hbm [thread:$0]  (%p1817_p0), %s1738_s23, 256, %s1743_s29, %s911_s11, %s1505_s10, %s1505_s10, %s1506_s1  }
 0x2ec PF: > { %s939_s30 = sand.u32 1, %s1477_s24   ;;  %p1818_p5 = scmp.ne.s32.totalorder %s1802_s8, 0 }
 0x2ed   : > { %p1819_p10 = scmp.ge.s32.totalorder %s1489_s27, 2  ;;  %s940_s28 = scalar_lea.sflag [#allocation4], %s939_s30 }
 0x2ef   : > { %p1181_p1 = pnand %p1819_p10, %p1818_p5 }
 0x2f1   : > { %p1182_p3 = pneg %p1181_p1 }
 0x2f3   : > { %1472 = dma.done.wait (%p1182_p3), %s940_s28, 256  }
 0x2f4   : > { %1474 = vsyncadd (%p1182_p3), %s940_s28, 4294967040  ;;  %p22_p6 = scmp.ge.s32.totalorder %s1630_s18, 4   ;;  %s1820_s24 = smov %s1481_s25 }
 0x2f5   : > { %s1821_s25 = smov %s1485_s26  ;;  %s1822_s26 = smov %s1640_s21 }
 0x2f6   : > { %s1823_s27 = smov %s1630_s18  ;;  %24 = sbr.rel (!%p22_p6) target bundleno = 9 (0x9), region = 105 }
 0x2fb   :  { %945 = vsyncpa [#allocation3], 1 }
 0x2fc   :  { %947 = vsyncpa [#allocation3 + $0x1], 1 }
 0x2fd   :  { %948 = vsyncpa [#allocation6], 1 }
 0x2fe   :  { %949 = vsyncpa [#allocation9], 1 }
 0x2ff   :  { %950 = vsyncpa [#allocation4], 1 }
 0x300   :  { %952 = vsyncpa [#allocation4 + $0x1], 1 }

</bundles_post_ra>
